<compile_context>
chip_gen: v6e
topology: v6e:2x2x1
jax: 0.10.0
libtpu: 0.0.40
codegen_flags: <defaults>
</compile_context>

<pallas_src>
import jax
import jax.numpy as jnp
from jax.experimental import pallas as pl
from jax.experimental.pallas import tpu as pltpu

N_BITS = 8
SYMMETRIC = False
N_LEVELS = 2 ** N_BITS          # asymmetric path: 256

LANE = 128                      # vreg lane width
SUBLANE = 8                     # vreg sublane count
_TARGET_BLOCK_BYTES = 1 << 20   # ~1 MiB blocks: near HBM roofline, safe for v5e scoped VMEM


def _round_up(a: int, b: int) -> int:
    return (a + b - 1) // b * b


def _plan_layout(total: int, itemsize: int):
    """Lane-dense layout: rows of 128 lanes; tile_rows multiple of 8 dividing rows."""
    rows_needed = _round_up(pl.cdiv(total, LANE), SUBLANE)
    cap_rows = max(SUBLANE,
                   (_TARGET_BLOCK_BYTES // (LANE * itemsize)) // SUBLANE * SUBLANE)
    tile_rows = min(cap_rows, rows_needed)
    rows = _round_up(rows_needed, tile_rows)
    return rows, tile_rows


def _to_lane_dense(x):
    """Flatten x to a (rows//8, 8, 128) lane-dense view (tail padded with edge values)."""
    total = x.size
    rows, tile_rows = _plan_layout(total, jnp.dtype(x.dtype).itemsize)
    flat = x.reshape(-1)
    padded_total = rows * LANE
    if padded_total != total:
        # 'edge' replicates the last element -> neutral for the min/max reduction.
        flat = jnp.pad(flat, (0, padded_total - total), mode='edge')
    x3d = flat.reshape(rows // SUBLANE, SUBLANE, LANE)
    return x3d, tile_rows, total


# ---------------------------------------------------------------------------
# Kernel 1: per-block partial min/max (init pass only)
# ---------------------------------------------------------------------------
def _minmax_kernel(x_ref, min_ref, max_ref):
    blk = x_ref[...].astype(jnp.float32)          # (G, 8, 128)
    # Reduce over the leading (vreg-tile) axis: pure VPU elementwise mins/maxs,
    # no cross-lane XLU work, no loop-carried SMEM scalar.
    min_ref[...] = jnp.min(blk, axis=0)           # (8, 128)
    max_ref[...] = jnp.max(blk, axis=0)


def _global_minmax(x3d, tile_rows):
    g_total = x3d.shape[0]
    tile_g = tile_rows // SUBLANE
    nblk = g_total // tile_g
    mins, maxs = pl.pallas_call(
        _minmax_kernel,
        out_shape=(jax.ShapeDtypeStruct((nblk * SUBLANE, LANE), jnp.float32),
                   jax.ShapeDtypeStruct((nblk * SUBLANE, LANE), jnp.float32)),
        grid_spec=pltpu.PrefetchScalarGridSpec(
            num_scalar_prefetch=0,
            grid=(nblk,),
            in_specs=[pl.BlockSpec((tile_g, SUBLANE, LANE), lambda i: (i, 0, 0))],
            out_specs=(pl.BlockSpec((SUBLANE, LANE), lambda i: (i, 0)),
                       pl.BlockSpec((SUBLANE, LANE), lambda i: (i, 0))),
        ),
        compiler_params=pltpu.CompilerParams(dimension_semantics=("parallel",)),
    )(x3d)
    # Tiny finish (nblk * 8 * 128 elements) in plain JAX.
    return jnp.min(mins), jnp.max(maxs)


# ---------------------------------------------------------------------------
# Kernel 2: elementwise fake-quantization (round / clamp / dequant)
# ---------------------------------------------------------------------------
def _quant_kernel(params_ref, x_ref, o_ref):
    inv_delta = params_ref[0]
    delta = params_ref[1]
    zp = params_ref[2]
    x = x_ref[...].astype(jnp.float32)            # native-dtype load, f32 in-register
    # round_ste forward == plain round (STE only changes the backward pass)
    x_int = jnp.round(x * inv_delta) + zp         # multiply by precomputed reciprocal
    x_quant = jnp.clip(x_int, 0.0, float(N_LEVELS - 1))
    o_ref[...] = ((x_quant - zp) * delta).astype(o_ref.dtype)


def _quantize_dequantize(x3d, params, tile_rows):
    g_total = x3d.shape[0]
    tile_g = tile_rows // SUBLANE
    nblk = g_total // tile_g
    return pl.pallas_call(
        _quant_kernel,
        out_shape=jax.ShapeDtypeStruct(x3d.shape, x3d.dtype),
        grid_spec=pltpu.PrefetchScalarGridSpec(
            num_scalar_prefetch=0,
            grid=(nblk,),
            in_specs=[pl.BlockSpec(memory_space=pltpu.MemorySpace.SMEM),
                      pl.BlockSpec((tile_g, SUBLANE, LANE), lambda i: (i, 0, 0))],
            out_specs=pl.BlockSpec((tile_g, SUBLANE, LANE), lambda i: (i, 0, 0)),
        ),
        compiler_params=pltpu.CompilerParams(dimension_semantics=("parallel",)),
    )(params, x3d)


# ---------------------------------------------------------------------------
# Module-like wrapper
# ---------------------------------------------------------------------------
class UniformAffineQuantizerPallas:
    """Pallas port of UniformAffineQuantizer (n_bits=8, asymmetric, tensor-wise, 'max')."""

    def __init__(self, n_bits: int = 8):
        assert n_bits == N_BITS
        self.n_bits = n_bits
        self.n_levels = N_LEVELS
        self.delta = None        # jnp f32 scalar
        self.zero_point = None   # jnp f32 scalar
        self.inited = False

    def __call__(self, x):
        orig_shape = x.shape
        # Stats are global (channel_wise=False) and the op is elementwise, so the
        # flattened lane-dense view is semantically equivalent to NCHW.
        x3d, tile_rows, total = _to_lane_dense(x)

        if not self.inited:
            # init_quantization_scale, 'max' path, asymmetric, tensor-wise.
            # NOTE: the PyTorch source computes delta from the RAW min/max
            # (x.max() - x.min()) and only clamps the min (to <= 0) for zero_point.
            x_min_raw, x_max_raw = _global_minmax(x3d, tile_rows)
            x_min = jnp.minimum(x_min_raw, 0.0)
            delta = (x_max_raw - x_min_raw) / jnp.float32(self.n_levels - 1)
            delta = jnp.maximum(delta, jnp.float32(1e-8))
            zero_point = jnp.round(-x_min / delta)
            self.delta = delta
            self.zero_point = zero_point
            self.inited = True
            # TODO(synk): running_stat / act_momentum_update, leaf_param, channel_wise
            # and 'mse' scale_method paths are not exercised by the module defaults and
            # are not implemented here.

        params = jnp.stack([jnp.float32(1.0) / self.delta,
                            self.delta,
                            self.zero_point]).astype(jnp.float32)
        out3d = _quantize_dequantize(x3d, params, tile_rows)
        return out3d.reshape(-1)[:total].reshape(orig_shape)


# ---------------------------------------------------------------------------
# Pure-JAX reference (faithful to the PyTorch 'max' / asymmetric path)
# ---------------------------------------------------------------------------
def _reference(x):
    xf = x.astype(jnp.float32)
    x_min_raw = jnp.min(xf)
    x_max_raw = jnp.max(xf)
    x_min = jnp.minimum(x_min_raw, 0.0)
    delta = (x_max_raw - x_min_raw) / (N_LEVELS - 1)
    delta = jnp.maximum(delta, 1e-8)
    zp = jnp.round(-x_min / delta)
    x_int = jnp.round(xf / delta) + zp
    x_quant = jnp.clip(x_int, 0.0, N_LEVELS - 1)
    return ((x_quant - zp) * delta).astype(x.dtype)


if __name__ == "__main__":
    key = jax.random.PRNGKey(0)
    # small NCHW activation, consistent with the diffusion-model activations this
    # quantizer is applied to in qdiff
    x = jax.random.normal(key, (2, 4, 16, 16), dtype=jnp.float32) * 3.0 + 0.5

    quantizer = UniformAffineQuantizerPallas(n_bits=8)
    out = quantizer(x)           # first call: init + quantize
    out = jax.block_until_ready(out)

    out2 = quantizer(x)          # second call: reuse stored delta / zero_point
    out2 = jax.block_until_ready(out2)

    ref = _reference(x)
    assert out.shape == x.shape and out.dtype == x.dtype
    assert bool(jnp.all(out == out2))

    diff = jnp.abs(out - ref)
    delta_val = float(quantizer.delta)
    tight = diff <= 1e-5
    # The kernel scales by a precomputed reciprocal (multiply) while the reference
    # divides; they can only disagree at exact round-to-nearest ties of x/delta, where
    # the output moves by exactly one quantization step. Allow only that (and rarely).
    tie_flip = jnp.abs(diff - delta_val) <= 1e-4
    assert bool(jnp.all(tight | tie_flip)), float(jnp.max(diff))
    assert float(jnp.mean(jnp.logical_not(tight))) <= 1e-3, "too many tie flips"

    print("KERNEL_OK")
</pallas_src>

<mosaic_0001>
module attributes {stable_mosaic.version = 11 : i64} {
  func.func @_minmax_kernel(%arg0: i32, %arg1: memref<2x8x128xf32, #tpu.memory_space<vmem>>, %arg2: memref<8x128xf32, #tpu.memory_space<vmem>>, %arg3: memref<8x128xf32, #tpu.memory_space<vmem>>) attributes {dimension_semantics = [#tpu.dimension_semantics<parallel>], iteration_bounds = array<i64: 1>, scalar_prefetch = 0 : i64, scratch_operands = 0 : i64, tpu.core_type = #tpu.core_type<tc>, window_params = [{transform_indices = @transform_0, window_bounds = array<i64: 2, 8, 128>}, {transform_indices = @transform_1, window_bounds = array<i64: 8, 128>}, {transform_indices = @transform_2, window_bounds = array<i64: 8, 128>}]} {
    %c0 = arith.constant 0 : index
    %c0_0 = arith.constant 0 : index
    %c0_1 = arith.constant 0 : index
    %0 = vector.load %arg1[%c0, %c0_0, %c0_1] : memref<2x8x128xf32, #tpu.memory_space<vmem>>, vector<2x8x128xf32>
    %cst = arith.constant dense<0x7F800000> : vector<8x128xf32>
    %1 = vector.multi_reduction <minimumf>, %0, %cst [0] : vector<2x8x128xf32> to vector<8x128xf32>
    %c0_2 = arith.constant 0 : index
    %c0_3 = arith.constant 0 : index
    %2 = vector.load %arg2[%c0_2, %c0_3] : memref<8x128xf32, #tpu.memory_space<vmem>>, vector<8x128xf32>
    tpu.vector_store %arg2[%c0_2, %c0_3], %1 {strides = array<i32>} : memref<8x128xf32, #tpu.memory_space<vmem>>, vector<8x128xf32>,
    %cst_4 = arith.constant dense<0xFF800000> : vector<8x128xf32>
    %3 = vector.multi_reduction <maximumf>, %0, %cst_4 [0] : vector<2x8x128xf32> to vector<8x128xf32>
    %c0_5 = arith.constant 0 : index
    %c0_6 = arith.constant 0 : index
    %4 = vector.load %arg3[%c0_5, %c0_6] : memref<8x128xf32, #tpu.memory_space<vmem>>, vector<8x128xf32>
    tpu.vector_store %arg3[%c0_5, %c0_6], %3 {strides = array<i32>} : memref<8x128xf32, #tpu.memory_space<vmem>>, vector<8x128xf32>,
    return
  }
  func.func @transform_0(%arg0: i32) -> (i32, i32, i32) {
    %c0_i32 = arith.constant 0 : i32
    %c0_i32_0 = arith.constant 0 : i32
    %c0_i32_1 = arith.constant 0 : i32
    return %arg0, %c0_i32, %c0_i32_0 : i32, i32, i32
  }
  func.func @transform_1(%arg0: i32) -> (i32, i32) {
    %c0_i32 = arith.constant 0 : i32
    %c0_i32_0 = arith.constant 0 : i32
    return %arg0, %c0_i32 : i32, i32
  }
  func.func @transform_2(%arg0: i32) -> (i32, i32) {
    %c0_i32 = arith.constant 0 : i32
    %c0_i32_0 = arith.constant 0 : i32
    return %arg0, %c0_i32 : i32, i32
  }
}

</mosaic_0001>

<bundles_post_ra>
// kernel: tpu_custom_call.1
= control target key start
LH: loop header
LB: loop body
LE: loop exit
PB: predicated region body
PF: predicated region fallthrough
CT: control target
= control target key end

     0   :  { %8 = vsyncpa [#allocation3], 0  ;;  %s161_s0 = inlined_call_operand.hbm [shape: f32[2,8,128], index: 0, kind: input, shape index: {}]   ;;  %s162_s1 = inlined_call_operand.hbm [shape: f32[8,128], index: 1, kind: output, shape index: {0}]   ;;  %s163_s2 = inlined_call_operand.hbm [shape: f32[8,128], index: 2, kind: output, shape index: {1}]  }
   0x1   :  { %9 = vsyncpa [#allocation4], 0 }
   0x2   :  { %10 = vsyncpa [#allocation7], 0  ;;  %s132_s9 = smov [#allocation2]  }
   0x3   :  { %s16_s10 = sshll.u32 %s132_s9, 4  ;;  %s17_s10 = int_to_ptr.vmem [resolvable:$true] %s16_s10 }
   0x4   :  { %s74_s11 = scalar_lea.vmem %s17_s10, 256  ;;  %p79_p1 = scmp.lt.s32.totalorder %s17_s10, %s17_s10 }
   0x5   :  { %p75_p0 = scmp.ne.s32.totalorder %s17_s10, %s74_s11  ;;  %p80_p2 = scmp.lt.s32.totalorder %s74_s11, %s74_s11 }
   0x7   :  { %p81_p3 = por %p80_p2, %p79_p1 }
   0x9   :  { %p82_p4 = pnand %p81_p3, %p75_p0 }
   0xb   :  { %85 = shalt.err (!%p82_p4)
}
   0xc   :  { %s133_s12 = smov 128   ;;  %s134_s13 = smov 8  }
   0xd   :  { %22 = dma.hbm_to_vmem [thread:$0]  %s161_s0, 256, %s17_s10, [#allocation3], %s133_s12, %s133_s12, %s134_s13  }
   0xe   :  { %126 = dma.done.wait [#allocation3], 256  }
   0xf   :  { %127 = vsyncadd [#allocation3], 4294967040  ;;  %s135_s16 = smov [#allocation5]   ;;  %s136_s18 = smov [#allocation6]   ;;  %v26_v0 = vld [vmem:[#allocation2] sm:$0xff]  ;;  %v27_v1 = vld [vmem:[#allocation2 + $0x8] sm:$0xff] }
  0x10   :  { %s38_s17 = sshll.u32 %s135_s16, 4  ;;  %s48_s19 = sshll.u32 %s136_s18, 4  ;;  %v28_v2 = vmin.f32 %v26_v0, %v27_v1  ;;  %v30_v3 = vmax.f32 %v26_v0, %v27_v1  ;;  %s39_s17 = int_to_ptr.vmem [resolvable:$true] %s38_s17  ;;  %s49_s19 = int_to_ptr.vmem [resolvable:$true] %s48_s19 }
  0x11   :  { %s86_s20 = scalar_lea.vmem %s39_s17, 128  ;;  %p91_p6 = scmp.lt.s32.totalorder %s39_s17, %s39_s17 }
  0x12   :  { %29 = vst [vmem:[#allocation5] sm:$0xff] %v28_v2  ;;  %31 = vst [vmem:[#allocation6] sm:$0xff] %v30_v3  ;;  %p87_p5 = scmp.ne.s32.totalorder %s39_s17, %s86_s20  ;;  %p92_p7 = scmp.lt.s32.totalorder %s86_s20, %s86_s20 }
  0x14   :  { %p93_p8 = por %p92_p7, %p91_p6 }
  0x16   :  { %p94_p9 = pnand %p93_p8, %p87_p5 }
  0x18   :  { %97 = shalt.err (!%p94_p9)
}
  0x19   :  { %41 = dma.vmem_to_hbm [thread:$0]  %s39_s17, 128, %s162_s1, [#allocation4]  }
  0x1a   :  { %s106_s22 = scalar_lea.vmem %s49_s19, 128  ;;  %p111_p11 = scmp.lt.s32.totalorder %s49_s19, %s49_s19 }
  0x1b   :  { %p107_p10 = scmp.ne.s32.totalorder %s49_s19, %s106_s22  ;;  %p112_p12 = scmp.lt.s32.totalorder %s106_s22, %s106_s22 }
  0x1d   :  { %p113_p13 = por %p112_p12, %p111_p11 }
  0x1f   :  { %p114_p0 = pnand %p113_p13, %p107_p10 }
  0x21   :  { %117 = shalt.err (!%p114_p0)
}
  0x22   :  { %51 = dma.vmem_to_hbm [thread:$0]  %s49_s19, 128, %s163_s2, [#allocation7]  }
  0x23   :  { %128 = dma.done.wait [#allocation4], 128  }
  0x24   :  { %129 = vsyncadd [#allocation4], 4294967168 }
  0x25   :  { %130 = dma.done.wait [#allocation7], 128  }
  0x26   :  { %131 = vsyncadd [#allocation7], 4294967168 }
  0x27   :  { %58 = vsyncpa [#allocation3], 1 }
  0x28   :  { %59 = vsyncpa [#allocation4], 1 }
  0x29   :  { %60 = vsyncpa [#allocation7], 1 }

</bundles_post_ra>
